<compile_context>
chip_gen: v7x
topology: tpu7x:2x2x1
jax: 0.10.0
libtpu: 0.0.40
codegen_flags: <defaults>
</compile_context>

<pallas_src>
import jax
import jax.numpy as jnp
from jax.experimental import pallas as pl
from jax.experimental.pallas import tpu as pltpu

_LANES = 128


def _logreg_kernel(x_ref, wb_ref, o_ref):
    # x_ref: (tile_rows, 128) f32 in VMEM; wb_ref: (2,) f32 in SMEM -> [w, b].
    w = wb_ref[0]
    b = wb_ref[1]
    z = x_ref[...] * w + b                      # VPU FMA (no MXU for 1-feature Linear)
    # sigmoid(z) = 1 / (1 + exp(-z)); exp -> EUP, exact reciprocal keeps 1e-6 tol.
    o_ref[...] = pl.reciprocal(1.0 + jnp.exp(-z), approx=False)


def logistic_regression(x, w, b, *, tile_rows=512):
    """x: (N, 1) f32, w: (1, 1) f32, b: (1,) f32 -> (N, 1) f32 (sigmoid(x*w + b))."""
    n = x.shape[0]
    x = x.astype(jnp.float32)

    # Lane-dense slab: pad N up so it views as (rows, 128) with the fast axis full.
    rows = pl.cdiv(n, _LANES)
    if rows > tile_rows:
        # Large-N streaming path: tile rows (multiple of 8) and grid over row-blocks.
        blk_rows = tile_rows
        rows_p = pl.cdiv(rows, blk_rows) * blk_rows
    else:
        # Small-N path: one grid step, full-array block (no (8,128) constraint).
        blk_rows = rows
        rows_p = rows

    n_pad = rows_p * _LANES
    x_slab = jnp.pad(x.reshape(-1), (0, n_pad - n)).reshape(rows_p, _LANES)

    # Pack the two scalar parameters into one tiny SMEM-resident array.
    wb = jnp.stack(
        [w.reshape(()).astype(jnp.float32), b.reshape(()).astype(jnp.float32)]
    )

    grid = (rows_p // blk_rows,)
    out_slab = pl.pallas_call(
        _logreg_kernel,
        out_shape=jax.ShapeDtypeStruct((rows_p, _LANES), jnp.float32),
        grid=grid,
        in_specs=[
            pl.BlockSpec((blk_rows, _LANES), lambda i: (i, 0)),
            pl.BlockSpec(memory_space=pltpu.MemorySpace.SMEM),  # scalars, untiled
        ],
        out_specs=pl.BlockSpec((blk_rows, _LANES), lambda i: (i, 0)),
        compiler_params=pltpu.CompilerParams(
            dimension_semantics=("parallel",),
        ),
    )(x_slab, wb)

    # Drop the lane-padding garbage and restore the (N, 1) module output shape.
    return out_slab.reshape(-1)[:n].reshape(n, 1)


if __name__ == "__main__":
    key = jax.random.PRNGKey(0)
    kw, kb = jax.random.split(key, 2)

    # Inputs consistent with the script: x = linspace(0, 10, 200), shape (N, 1).
    N = 200
    x = jnp.linspace(0.0, 10.0, N, dtype=jnp.float32).reshape(N, 1)

    # Deterministic parameter init for Linear(1, 1) (PyTorch-style U(-1, 1), fan_in=1).
    w = jax.random.uniform(kw, (1, 1), jnp.float32, minval=-1.0, maxval=1.0)
    b = jax.random.uniform(kb, (1,), jnp.float32, minval=-1.0, maxval=1.0)

    y = logistic_regression(x, w, b)
    jax.block_until_ready(y)

    # Reference check in plain JAX.
    y_ref = jax.nn.sigmoid(x @ w.T + b)
    assert y.shape == (N, 1)
    assert jnp.allclose(y, y_ref, atol=1e-6), "mismatch vs reference"

    print("KERNEL_OK")
</pallas_src>

<mosaic_0001>
module attributes {stable_mosaic.version = 11 : i64} {
  func.func @_logreg_kernel(%arg0: i32, %arg1: memref<2x128xf32, #tpu.memory_space<vmem>>, %arg2: memref<2xf32, #tpu.memory_space<smem>>, %arg3: memref<2x128xf32, #tpu.memory_space<vmem>>) attributes {dimension_semantics = [#tpu.dimension_semantics<parallel>], iteration_bounds = array<i64: 1>, scalar_prefetch = 0 : i64, scratch_operands = 0 : i64, tpu.core_type = #tpu.core_type<tc>, window_params = [{transform_indices = @transform_0, window_bounds = array<i64: 2, 128>}, {transform_indices = @transform_1, window_bounds = array<i64: 2>}, {transform_indices = @transform_2, window_bounds = array<i64: 2, 128>}]} {
    %c0 = arith.constant 0 : index
    %0 = memref.load %arg2[%c0] : memref<2xf32, #tpu.memory_space<smem>>
    %c1 = arith.constant 1 : index
    %1 = memref.load %arg2[%c1] : memref<2xf32, #tpu.memory_space<smem>>
    %c0_0 = arith.constant 0 : index
    %c0_1 = arith.constant 0 : index
    %2 = vector.load %arg1[%c0_0, %c0_1] : memref<2x128xf32, #tpu.memory_space<vmem>>, vector<2x128xf32>
    %3 = vector.broadcast %0 : f32 to vector<2x128xf32>
    %4 = arith.mulf %2, %3 : vector<2x128xf32>
    %5 = vector.broadcast %1 : f32 to vector<2x128xf32>
    %6 = arith.addf %4, %5 : vector<2x128xf32>
    %cst = arith.constant 0.000000e+00 : f32
    %7 = vector.broadcast %cst : f32 to vector<2x128xf32>
    %8 = arith.subf %7, %6 : vector<2x128xf32>
    %9 = math.exp %8 : vector<2x128xf32>
    %cst_2 = arith.constant 1.000000e+00 : f32
    %10 = vector.broadcast %cst_2 : f32 to vector<2x128xf32>
    %11 = arith.addf %10, %9 : vector<2x128xf32>
    %12 = tpu.reciprocal %11 : vector<2x128xf32> -> vector<2x128xf32>
    %c0_3 = arith.constant 0 : index
    %c0_4 = arith.constant 0 : index
    %13 = vector.load %arg3[%c0_3, %c0_4] : memref<2x128xf32, #tpu.memory_space<vmem>>, vector<2x128xf32>
    tpu.vector_store %arg3[%c0_3, %c0_4], %12 {strides = array<i32>} : memref<2x128xf32, #tpu.memory_space<vmem>>, vector<2x128xf32>,
    return
  }
  func.func @transform_0(%arg0: i32) -> (i32, i32) {
    %c0_i32 = arith.constant 0 : i32
    %c0_i32_0 = arith.constant 0 : i32
    return %arg0, %c0_i32 : i32, i32
  }
  func.func @transform_1(%arg0: i32) -> i32 {
    %c0_i32 = arith.constant 0 : i32
    %c0_i32_0 = arith.constant 0 : i32
    return %c0_i32 : i32
  }
  func.func @transform_2(%arg0: i32) -> (i32, i32) {
    %c0_i32 = arith.constant 0 : i32
    %c0_i32_0 = arith.constant 0 : i32
    return %arg0, %c0_i32 : i32, i32
  }
}

</mosaic_0001>

<bundles_post_ra>
// kernel: tpu_custom_call.1
= control target key start
LH: loop header
LB: loop body
LE: loop exit
PB: predicated region body
PF: predicated region fallthrough
CT: control target
= control target key end

     0   :  { %7 = vsyncpa [#allocation3], 0  ;;  %s181_s0 = inlined_call_operand.hbm [shape: f32[2,128], index: 0, kind: input, shape index: {}]   ;;  %s182_s1 = inlined_call_operand.vmem [shape: f32[2], index: 1, kind: input, shape index: {}]   ;;  %s183_s2 = inlined_call_operand.hbm [shape: f32[2,128], index: 2, kind: output, shape index: {}]  }
   0x1   :  { %8 = vsyncpa [#allocation5], 0 }
   0x2   :  { %9 = vsyncpa [#allocation4], 0  ;;  %s26_s11 = sshll.u32 %s182_s1, 4  ;;  %s136_s12 = smov [#allocation2]   ;;  %s27_s11 = int_to_ptr.vmem [resolvable:$true] %s26_s11 }
   0x3   :  { %s16_s13 = sshll.u32 %s136_s12, 4  ;;  %s74_s16 = scalar_lea.hbm %s181_s0, 32  ;;  %s17_s13 = int_to_ptr.vmem [resolvable:$true] %s16_s13 }
   0x4   :  { %p75_p0 = scmp.ne.s32.totalorder %s181_s0, %s74_s16  ;;  %p78_p1 = scmp.lt.u32.totalorder %s74_s16, %s181_s0 }
   0x6   :  { %p80_p2 = pnand %p78_p1, %p75_p0 }
   0x8   :  { %83 = shalt.err (!%p80_p2)
}
   0x9   :  { %s84_s21 = scalar_lea.vmem %s17_s13, 32  ;;  %p89_p4 = scmp.lt.s32.totalorder %s17_s13, %s17_s13 }
   0xa   :  { %p85_p3 = scmp.ne.s32.totalorder %s17_s13, %s84_s21  ;;  %p90_p5 = scmp.lt.s32.totalorder %s84_s21, %s84_s21 }
   0xc   :  { %p91_p6 = por %p90_p5, %p89_p4 }
   0xe   :  { %p92_p7 = pnand %p91_p6, %p85_p3 }
  0x10   :  { %95 = shalt.err (!%p92_p7)
}
  0x11   :  { %19 = dma.hbm_to_vmem [thread:$0]  %s181_s0, 32, %s17_s13, [#allocation3]  }
  0x12   :  { %s96_s23 = scalar_lea.vmem %s27_s11, 16  ;;  %p101_p9 = scmp.lt.s32.totalorder %s27_s11, %s27_s11 }
  0x13   :  { %p97_p8 = scmp.ne.s32.totalorder %s27_s11, %s96_s23  ;;  %p102_p10 = scmp.lt.s32.totalorder %s96_s23, %s96_s23 }
  0x15   :  { %p103_p11 = por %p102_p10, %p101_p9 }
  0x17   :  { %p104_p12 = pnand %p103_p11, %p97_p8 }
  0x19   :  { %107 = shalt.err (!%p104_p12)
}
  0x1a   :  { %s137_s24 = smov [#allocation6]  }
  0x1b   :  { %29 = dma.vmem_to_smem %s27_s11, 16, %s137_s24, [#allocation5]  }
  0x1c   :  { %130 = dma.done.wait [#allocation3], 32  }
  0x1d   :  { %131 = vsyncadd [#allocation3], 4294967264 }
  0x1e   :  { %132 = dma.done.wait [#allocation5], 16  }
  0x1f   :  { %133 = vsyncadd [#allocation5], 4294967280 }
  0x20   :  { %36 = sfence }
  0x21   :  { %s37_s25 = sld [smem:[#allocation6]]  ;;  %s66_s26 = sld [smem:[#allocation6 + $0x1]]  ;;  %v39_v0 = vld [vmem:[#allocation2] sm:$0x3] }
  0x22   :  { %s138_s0 = smov [#allocation7]  }
  0x23   :  { %s56_s27 = sshll.u32 %s138_s0, 4  ;;  %s57_s27 = int_to_ptr.vmem [resolvable:$true] %s56_s27 }
  0x24   :  { %s108_s28 = scalar_lea.vmem %s57_s27, 32  ;;  %p113_p0 = scmp.lt.s32.totalorder %s57_s27, %s57_s27 }
  0x25   :  { %p109_p13 = scmp.ne.s32.totalorder %s57_s27, %s108_s28  ;;  %p114_p1 = scmp.lt.s32.totalorder %s108_s28, %s108_s28 }
  0x27   :  { %v40_v1 = vstv %s37_s25  ;;  %v42_v2 = vstv %s66_s26  ;;  %p115_p2 = por %p114_p1, %p113_p0 }
  0x28   :  { %v41_v3 = vmul.f32 %v40_v1, %v39_v0 }
  0x29   :  { %p116_p3 = pnand %p115_p2, %p109_p13 }
  0x2a   :  { %v43_v4 = vadd.f32 %v42_v2, %v41_v3 }
  0x2c   :  { %v44_v5 = vsub.f32 0.0, %v43_v4 }
  0x2e   :  { %v45_v6 = vmul.f32 1.442695, %v44_v5 }
  0x30   :  { %70 = vpow2.f32 %v45_v6 }
  0x3a   :  { %v71_v7 = vpop.eup %70 }
  0x3b   :  { %v47_v8 = vadd.f32 1.0, %v71_v7 }
  0x3d   :  { %72 = vrcp.f32 %v47_v8 }
  0x47   :  { %v73_v9 = vpop.eup %72 }
  0x48   :  { %49 = vst [vmem:[#allocation7] sm:$0x3] %v73_v9 }
  0x49   :  { %119 = shalt.err (!%p116_p3)
}
  0x4a   :  { %s120_s3 = scalar_lea.hbm %s183_s2, 32 }
  0x4b   :  { %p121_p4 = scmp.ne.s32.totalorder %s183_s2, %s120_s3  ;;  %p124_p5 = scmp.lt.u32.totalorder %s120_s3, %s183_s2 }
  0x4d   :  { %p126_p6 = pnand %p124_p5, %p121_p4 }
  0x4f   :  { %129 = shalt.err (!%p126_p6)
}
  0x50   :  { %59 = dma.vmem_to_hbm [thread:$0]  %s57_s27, 32, %s183_s2, [#allocation4]  }
  0x51   :  { %134 = dma.done.wait [#allocation4], 32  }
  0x52   :  { %135 = vsyncadd [#allocation4], 4294967264 }
  0x53   :  { %63 = vsyncpa [#allocation3], 1 }
  0x54   :  { %64 = vsyncpa [#allocation4], 1 }
  0x55   :  { %65 = vsyncpa [#allocation5], 1 }

</bundles_post_ra>
